<compile_context>
chip_gen: v6e
topology: v6e:2x2x1
jax: 0.10.0
libtpu: 0.0.40
codegen_flags: <defaults>
</compile_context>

<pallas_src>
import functools

import jax
import jax.numpy as jnp
from jax.experimental import pallas as pl
from jax.experimental.pallas import tpu as pltpu


_TARGET_BLOCK_BYTES = 8 * 1024 * 1024   # ~8 MiB x block: v7x-safe, amortizes step overhead
_VMEM_LIMIT_BYTES = 48 * 1024 * 1024    # explicit scoped-VMEM budget (< 64 MiB v7x physical)


def _sublane_align(dtype) -> int:
    """Sublane alignment per dtype: 8 (f32), 16 (bf16/f16), 32 (int8/fp8)."""
    bits = jnp.dtype(dtype).itemsize * 8
    return max(8, 256 // max(bits, 1))


def _rescale_kernel(x_ref, w_ref, o_ref, *, row_tile):
    # x_ref / o_ref: (rt, ct) tile in VMEM.
    # w_ref: full (rows_padded, 1) scale column, resident in VMEM; slice the
    # rows belonging to the current row tile (start is always 8-aligned).
    start = pl.multiple_of(pl.program_id(0) * row_tile, 8)
    w = w_ref[pl.ds(start, row_tile), :]
    # Multiply in the promoted dtype (matches PyTorch promotion), then cast.
    o_ref[...] = (x_ref[...] * w).astype(o_ref.dtype)


def rescale(x: jax.Array, weight: jax.Array) -> jax.Array:
    """Per-channel rescale: out[n, c, h, w] = weight[c, 0, 0] * x[n, c, h, w]."""
    N, C, H, W = x.shape
    assert weight.shape == (C, 1, 1)
    out_dtype = jnp.result_type(x.dtype, weight.dtype)

    # ---- Pick a lane-dense 2D factorization -------------------------------
    if (H * W) % 128 == 0:
        rows, cols = N * C, H * W
        w_col = jnp.broadcast_to(weight.reshape(1, C), (N, C)).reshape(rows, 1)
    elif W % 128 == 0:
        rows, cols = N * C * H, W
        w_col = jnp.broadcast_to(weight.reshape(1, C, 1), (N, C, H)).reshape(rows, 1)
    else:
        # TODO(synk): lane-sparse fallback (last dim not a multiple of 128) pays
        # masked partial stores; padding the lane dim would trade an extra copy.
        rows, cols = N * C, H * W
        w_col = jnp.broadcast_to(weight.reshape(1, C), (N, C)).reshape(rows, 1)
    x2 = x.reshape(rows, cols)

    # ---- Tile sizing -------------------------------------------------------
    itemsize = jnp.dtype(x.dtype).itemsize
    align = _sublane_align(x.dtype)

    # Column (lane) tile: a multiple of 128 whenever the shape allows.
    if cols >= 128:
        max_ct = max(128, (_TARGET_BLOCK_BYTES // (align * itemsize)) // 128 * 128)
        ct = min((cols // 128) * 128, max_ct)
    else:
        ct = cols  # tiny last dim: full extent (masked stores, acceptable fallback)

    # Row (sublane) tile: largest dtype-aligned tile within the block budget.
    max_rt = max(align, (_TARGET_BLOCK_BYTES // (ct * itemsize)) // align * align)
    rt = rows if rows <= max_rt else max_rt
    grid_r = pl.cdiv(rows, rt)
    grid_c = pl.cdiv(cols, ct)

    # v7x megacore: guarantee >= 2 parallel blocks when the tensor allows it.
    if grid_r * grid_c == 1 and rows >= 2 * align:
        half = -(-rows // 2)
        rt = ((half + align - 1) // align) * align
        grid_r = pl.cdiv(rows, rt)

    # Pad the (tiny) weight column so the in-kernel row slice never goes OOB
    # on the ragged last row block.
    rows_padded = int(grid_r) * rt
    if rows_padded > rows:
        w_col = jnp.pad(w_col, ((0, rows_padded - rows), (0, 0)))

    kernel = functools.partial(_rescale_kernel, row_tile=rt)
    out2 = pl.pallas_call(
        kernel,
        out_shape=jax.ShapeDtypeStruct((rows, cols), out_dtype),
        grid=(grid_r, grid_c),
        in_specs=[
            pl.BlockSpec((rt, ct), lambda i, j: (i, j)),          # x tile
            pl.BlockSpec((rows_padded, 1), lambda i, j: (0, 0)),  # resident weight column
        ],
        out_specs=pl.BlockSpec((rt, ct), lambda i, j: (i, j)),
        compiler_params=pltpu.CompilerParams(
            dimension_semantics=("parallel", "parallel"),
            vmem_limit_bytes=_VMEM_LIMIT_BYTES),
    )(x2, w_col)

    return out2.reshape(N, C, H, W)


if __name__ == "__main__":
    N, C, H, W = 2, 4, 16, 16

    key = jax.random.PRNGKey(0)
    x = jax.random.normal(key, (N, C, H, W), dtype=jnp.float32)

    # PyTorch __init__ sets weight = ones(C, 1, 1).  Use a deterministic
    # non-trivial value so the per-channel broadcast is actually exercised.
    weight = (1.0 + 0.1 * jnp.arange(C, dtype=jnp.float32)).reshape(C, 1, 1)

    out = jax.block_until_ready(rescale(x, weight))

    # Reference check (plain JAX broadcast, same as PyTorch `weight * x`).
    ref = weight.reshape(1, C, 1, 1) * x
    assert out.shape == x.shape
    assert out.dtype == jnp.result_type(x.dtype, weight.dtype)
    assert jnp.allclose(out, ref, atol=1e-6, rtol=1e-6)

    print("KERNEL_OK")
</pallas_src>

<mosaic_0001>
module attributes {stable_mosaic.version = 11 : i64} {
  func.func @_rescale_kernel(%arg0: i32, %arg1: i32, %arg2: memref<8x256xf32, #tpu.memory_space<vmem>>, %arg3: memref<8x1xf32, #tpu.memory_space<vmem>>, %arg4: memref<8x256xf32, #tpu.memory_space<vmem>>) attributes {dimension_semantics = [#tpu.dimension_semantics<parallel>, #tpu.dimension_semantics<parallel>], iteration_bounds = array<i64: 1, 1>, scalar_prefetch = 0 : i64, scratch_operands = 0 : i64, tpu.core_type = #tpu.core_type<tc>, window_params = [{transform_indices = @transform_0, window_bounds = array<i64: 8, 256>}, {pipeline_mode = #tpu.pipeline_mode<synchronous>, transform_indices = @transform_1, window_bounds = array<i64: 8, 1>}, {transform_indices = @transform_2, window_bounds = array<i64: 8, 256>}]} {
    %c8_i32 = arith.constant 8 : i32
    %0 = arith.muli %arg0, %c8_i32 : i32
    %1 = tpu.assume_multiple %0, 8 : i32
    %2 = arith.index_cast %1 : i32 to index
    %c0 = arith.constant 0 : index
    %3 = vector.load %arg3[%2, %c0] : memref<8x1xf32, #tpu.memory_space<vmem>>, vector<8x1xf32>
    %c0_0 = arith.constant 0 : index
    %c0_1 = arith.constant 0 : index
    %4 = vector.load %arg2[%c0_0, %c0_1] : memref<8x256xf32, #tpu.memory_space<vmem>>, vector<8x256xf32>
    %5 = vector.broadcast %3 : vector<8x1xf32> to vector<8x256xf32>
    %6 = arith.mulf %4, %5 : vector<8x256xf32>
    %c0_2 = arith.constant 0 : index
    %c0_3 = arith.constant 0 : index
    %7 = vector.load %arg4[%c0_2, %c0_3] : memref<8x256xf32, #tpu.memory_space<vmem>>, vector<8x256xf32>
    tpu.vector_store %arg4[%c0_2, %c0_3], %6 {strides = array<i32>} : memref<8x256xf32, #tpu.memory_space<vmem>>, vector<8x256xf32>,
    return
  }
  func.func @transform_0(%arg0: i32, %arg1: i32) -> (i32, i32) {
    %c0_i32 = arith.constant 0 : i32
    return %arg0, %arg1 : i32, i32
  }
  func.func @transform_1(%arg0: i32, %arg1: i32) -> (i32, i32) {
    %c0_i32 = arith.constant 0 : i32
    %c0_i32_0 = arith.constant 0 : i32
    %c0_i32_1 = arith.constant 0 : i32
    return %c0_i32, %c0_i32_0 : i32, i32
  }
  func.func @transform_2(%arg0: i32, %arg1: i32) -> (i32, i32) {
    %c0_i32 = arith.constant 0 : i32
    return %arg0, %arg1 : i32, i32
  }
}

</mosaic_0001>

<bundles_post_ra>
// kernel: tpu_custom_call.1
= control target key start
LH: loop header
LB: loop body
LE: loop exit
PB: predicated region body
PF: predicated region fallthrough
CT: control target
= control target key end

     0   :  { %7 = vsyncpa [#allocation3], 0  ;;  %s128_s0 = inlined_call_operand.hbm [shape: f32[8,256], index: 0, kind: input, shape index: {}]   ;;  %s129_s1 = inlined_call_operand.vmem [shape: f32[8,1], index: 1, kind: input, shape index: {}]   ;;  %s130_s2 = inlined_call_operand.hbm [shape: f32[8,256], index: 2, kind: output, shape index: {}]  }
   0x1   :  { %8 = vsyncpa [#allocation4], 0  ;;  %s101_s9 = smov [#allocation2]  }
   0x2   :  { %s15_s10 = sshll.u32 %s101_s9, 4  ;;  %s16_s10 = int_to_ptr.vmem [resolvable:$true] %s15_s10 }
   0x3   :  { %s65_s11 = scalar_lea.vmem %s16_s10, 256  ;;  %p70_p1 = scmp.lt.s32.totalorder %s16_s10, %s16_s10 }
   0x4   :  { %p66_p0 = scmp.ne.s32.totalorder %s16_s10, %s65_s11  ;;  %p71_p2 = scmp.lt.s32.totalorder %s65_s11, %s65_s11 }
   0x6   :  { %p72_p3 = por %p71_p2, %p70_p1 }
   0x8   :  { %p73_p4 = pnand %p72_p3, %p66_p0 }
   0xa   :  { %76 = shalt.err (!%p73_p4)
}
   0xb   :  { %18 = dma.hbm_to_vmem [thread:$0]  %s128_s0, 256, %s16_s10, [#allocation3]  }
   0xc   :  { %97 = dma.done.wait [#allocation3], 256  }
   0xd   :  { %98 = vsyncadd [#allocation3], 4294967040  ;;  %v102_v0 = vmov 0   ;;  %v26_v1 = vld [vmem:[%s129_s1] sm:$0xff]  ;;  %v28_v3 = vld [vmem:[#allocation2 + $0x8] sm:$0xff]  ;;  %s103_s16 = smov [#allocation5]  }
   0xe   :  { %56 = vset.pattern.permute.xlu0 %v102_v0  ;;  %v27_v2 = vld [vmem:[#allocation2] sm:$0xff]  ;;  %s44_s17 = sshll.u32 %s103_s16, 4  ;;  %s45_s17 = int_to_ptr.vmem [resolvable:$true] %s44_s17 }
   0xf   :  { %31 = vperm.xlu0 %56, %v26_v1   ;;  %s77_s0 = scalar_lea.vmem %s45_s17, 256  ;;  %p82_p6 = scmp.lt.s32.totalorder %s45_s17, %s45_s17 }
  0x10   :  { %p78_p5 = scmp.ne.s32.totalorder %s45_s17, %s77_s0  ;;  %p83_p7 = scmp.lt.s32.totalorder %s77_s0, %s77_s0 }
  0x12   :  { %p84_p8 = por %p83_p7, %p82_p6 }
  0x14   :  { %p85_p9 = pnand %p84_p8, %p78_p5 }
  0x8a   :  { %v32_v4 = vpop.permute.xlu0 %31 }
  0x8b   :  { %v34_v5 = vmul.f32 %v32_v4, %v27_v2  ;;  %v35_v6 = vmul.f32 %v32_v4, %v28_v3 }
  0x8d   :  { %36 = vst [vmem:[#allocation5] sm:$0xff] %v34_v5  ;;  %37 = vst [vmem:[#allocation5 + $0x8] sm:$0xff] %v35_v6 }
  0x8e   :  { %88 = shalt.err (!%p85_p9)
}
  0x8f   :  { %47 = dma.vmem_to_hbm [thread:$0]  %s45_s17, 256, %s130_s2, [#allocation4]  }
  0x90   :  { %99 = dma.done.wait [#allocation4], 256  }
  0x91   :  { %100 = vsyncadd [#allocation4], 4294967040 }
  0x92   :  { %51 = vsyncpa [#allocation3], 1 }
  0x93   :  { %52 = vsyncpa [#allocation4], 1 }

</bundles_post_ra>
